<compile_context>
chip_gen: v7x
topology: tpu7x:2x2x1
jax: 0.10.0
libtpu: 0.0.40
codegen_flags: <defaults>
</compile_context>

<pallas_src>
import jax
import jax.numpy as jnp
from jax.experimental import pallas as pl
from jax.experimental.pallas import tpu as pltpu


def _local_op_kernel(x_ref, w1_ref, w2_ref, bias_ref, o_ref):
    # x_ref:   (BB, S, D)   input slab block (D = in_channels on lanes)
    # w1_ref:  (D, C)       conv1 weight, BN1 scale pre-folded into columns
    # w2_ref:  (C, C)       conv2 weight, BN2 scale pre-folded into columns
    # bias_ref:(2, C)       [bn1 shift; bn2 shift]
    # o_ref:   (BB, C)      max-pooled output block
    BB, S, D = x_ref.shape
    C = o_ref.shape[-1]

    x = x_ref[...].reshape(BB * S, D)                    # 128-row LHS for the MXU
    bias = bias_ref[...].astype(jnp.float32)             # (2, C)

    h = jnp.dot(x, w1_ref[...], preferred_element_type=jnp.float32)       # (BB*S, C)
    h = jnp.maximum(h + bias[0:1, :], 0.0)                                  # bn1 shift + relu (f32 VPU)
    h = jnp.dot(h.astype(w2_ref.dtype), w2_ref[...],
                preferred_element_type=jnp.float32)                        # (BB*S, C)
    h = jnp.maximum(h + bias[1:2, :], 0.0)                                  # bn2 shift + relu

    # adaptive_max_pool1d(., 1): max over the s axis of each slab.
    o_ref[...] = jnp.max(h.reshape(BB, S, C), axis=1).astype(o_ref.dtype)  # (BB, C)


def _choose_bb(B, s):
    """Largest divisor of B such that BB*s fills the MXU rows while keeping
    >= 2 grid steps (so both v7x TensorCores are used) and a moderate block."""
    divisors = [bb for bb in range(1, B + 1) if B % bb == 0]
    good = [bb for bb in divisors if B // bb >= 2] or divisors
    capped = [bb for bb in good if bb * s <= 1024] or good
    return max(capped)


def local_op_forward(x, w1, w2, g1, beta1, mean1, var1, g2, beta2, mean2, var2,
                     eps=1e-5, matmul_dtype=jnp.float32):
    """x: (b, n, s, d).  Returns (b, C, n) matching the PyTorch module.

    matmul_dtype=jnp.bfloat16 is the recommended v6e/v7x setting (MXU runs bf16
    natively, halves x/w DMA bytes); accumulation and the bias/relu/max stay f32.
    """
    b, n, s, d = x.shape
    C = w1.shape[0]                      # conv weights are (out, in) like PyTorch
    B = b * n

    # Fold batch-norm (inference) into the conv weights (scale) and a bias (shift).
    inv1 = g1 / jnp.sqrt(var1 + eps)
    inv2 = g2 / jnp.sqrt(var2 + eps)
    w1f = (w1.T * inv1[None, :]).astype(matmul_dtype)        # (d, C) scale folded per column
    w2f = (w2.T * inv2[None, :]).astype(matmul_dtype)        # (C, C)
    bias = jnp.stack([beta1 - mean1 * inv1,
                      beta2 - mean2 * inv2], axis=0).astype(jnp.float32)   # (2, C)

    # (b, n, s, d) -> permute(0,1,3,2) -> (b*n, d, s); the kernel consumes the
    # transpose of each (d, s) slab, i.e. (B, s, d) == a plain reshape of x.
    x_bsd = x.reshape(B, s, d).astype(matmul_dtype)

    BB = _choose_bb(B, s)                # e.g. 8 for B=16, s=16 -> 128-row LHS, 2 grid steps
    grid = (B // BB,)

    out = pl.pallas_call(
        _local_op_kernel,
        out_shape=jax.ShapeDtypeStruct((B, C), jnp.float32),
        grid_spec=pltpu.PrefetchScalarGridSpec(
            num_scalar_prefetch=0,
            grid=grid,
            in_specs=[
                pl.BlockSpec((BB, s, d), lambda i: (i, 0, 0)),
                # Resident operands: constant block index -> fetched once by the
                # pipeline; BN fold already removed two of them.
                pl.BlockSpec((d, C), lambda i: (0, 0)),
                pl.BlockSpec((C, C), lambda i: (0, 0)),
                pl.BlockSpec((2, C), lambda i: (0, 0)),
            ],
            # (BB, C) = (8, 64): sublane-aligned, lane-dense output block.
            out_specs=pl.BlockSpec((BB, C), lambda i: (i, 0)),
        ),
        compiler_params=pltpu.CompilerParams(
            dimension_semantics=("parallel",)),
    )(x_bsd, w1f, w2f, bias)

    # (B, C) -> (b, n, C) -> (b, C, n)
    return out.reshape(b, n, C).transpose(0, 2, 1)


def _reference(x, w1, w2, g1, beta1, mean1, var1, g2, beta2, mean2, var2, eps=1e-5):
    b, n, s, d = x.shape
    C = w1.shape[0]
    xr = x.transpose(0, 1, 3, 2).reshape(-1, d, s)            # (B, d, s)
    h = jnp.einsum("cd,bds->bcs", w1, xr)
    h = g1[None, :, None] * (h - mean1[None, :, None]) / jnp.sqrt(var1[None, :, None] + eps) \
        + beta1[None, :, None]
    h = jnp.maximum(h, 0.0)
    h = jnp.einsum("ce,bes->bcs", w2, h)
    h = g2[None, :, None] * (h - mean2[None, :, None]) / jnp.sqrt(var2[None, :, None] + eps) \
        + beta2[None, :, None]
    h = jnp.maximum(h, 0.0)
    h = jnp.max(h, axis=-1)                                   # (B, C)
    return h.reshape(b, n, C).transpose(0, 2, 1)


if __name__ == "__main__":
    key = jax.random.PRNGKey(0)
    b, n, s, d = 2, 8, 16, 32          # in_channels = d = 32
    C = 64                             # out_channels

    keys = jax.random.split(key, 8)
    x = jax.random.normal(keys[0], (b, n, s, d), dtype=jnp.float32)
    w1 = jax.random.normal(keys[1], (C, d), dtype=jnp.float32) * 0.1   # conv1 weight (out,in)
    w2 = jax.random.normal(keys[2], (C, C), dtype=jnp.float32) * 0.1   # conv2 weight (out,in)
    g1 = 1.0 + 0.1 * jax.random.normal(keys[3], (C,), dtype=jnp.float32)
    beta1 = 0.1 * jax.random.normal(keys[4], (C,), dtype=jnp.float32)
    mean1 = 0.05 * jax.random.normal(keys[5], (C,), dtype=jnp.float32)
    var1 = jnp.ones((C,), jnp.float32) * 1.2
    g2 = 1.0 + 0.1 * jax.random.normal(keys[6], (C,), dtype=jnp.float32)
    beta2 = 0.1 * jax.random.normal(keys[7], (C,), dtype=jnp.float32)
    mean2 = jnp.zeros((C,), jnp.float32)
    var2 = jnp.ones((C,), jnp.float32) * 0.9

    ref = _reference(x, w1, w2, g1, beta1, mean1, var1, g2, beta2, mean2, var2)

    # f32 matmul path (tight check).
    out = local_op_forward(x, w1, w2, g1, beta1, mean1, var1, g2, beta2, mean2, var2)
    out = jax.block_until_ready(out)
    assert out.shape == (b, C, n), out.shape
    assert jnp.allclose(out, ref, atol=2e-4, rtol=2e-4), float(jnp.max(jnp.abs(out - ref)))

    # bf16 matmul-operand path (v6e/v7x MXU option; accumulation stays f32).
    out_bf16 = local_op_forward(x, w1, w2, g1, beta1, mean1, var1, g2, beta2,
                                mean2, var2, matmul_dtype=jnp.bfloat16)
    out_bf16 = jax.block_until_ready(out_bf16)
    assert out_bf16.shape == (b, C, n), out_bf16.shape
    assert jnp.allclose(out_bf16, ref, atol=5e-2, rtol=5e-2), \
        float(jnp.max(jnp.abs(out_bf16 - ref)))

    print("KERNEL_OK")
</pallas_src>

<mosaic_0001>
module attributes {stable_mosaic.version = 11 : i64} {
  func.func @_local_op_kernel(%arg0: i32, %arg1: memref<8x16x32xf32, #tpu.memory_space<vmem>>, %arg2: memref<32x64xf32, #tpu.memory_space<vmem>>, %arg3: memref<64x64xf32, #tpu.memory_space<vmem>>, %arg4: memref<2x64xf32, #tpu.memory_space<vmem>>, %arg5: memref<8x64xf32, #tpu.memory_space<vmem>>) attributes {dimension_semantics = [#tpu.dimension_semantics<parallel>], iteration_bounds = array<i64: 2>, scalar_prefetch = 0 : i64, scratch_operands = 0 : i64, tpu.core_type = #tpu.core_type<tc>, window_params = [{transform_indices = @transform_0, window_bounds = array<i64: 8, 16, 32>}, {pipeline_mode = #tpu.pipeline_mode<synchronous>, transform_indices = @transform_1, window_bounds = array<i64: 32, 64>}, {pipeline_mode = #tpu.pipeline_mode<synchronous>, transform_indices = @transform_2, window_bounds = array<i64: 64, 64>}, {pipeline_mode = #tpu.pipeline_mode<synchronous>, transform_indices = @transform_3, window_bounds = array<i64: 2, 64>}, {transform_indices = @transform_4, window_bounds = array<i64: 8, 64>}]} {
    %c0 = arith.constant 0 : index
    %c0_0 = arith.constant 0 : index
    %c0_1 = arith.constant 0 : index
    %0 = vector.load %arg1[%c0, %c0_0, %c0_1] : memref<8x16x32xf32, #tpu.memory_space<vmem>>, vector<8x16x32xf32>
    %1 = vector.shape_cast %0 : vector<8x16x32xf32> to vector<128x32xf32>
    %c0_2 = arith.constant 0 : index
    %c0_3 = arith.constant 0 : index
    %2 = vector.load %arg4[%c0_2, %c0_3] : memref<2x64xf32, #tpu.memory_space<vmem>>, vector<2x64xf32>
    %c0_4 = arith.constant 0 : index
    %c0_5 = arith.constant 0 : index
    %3 = vector.load %arg2[%c0_4, %c0_5] : memref<32x64xf32, #tpu.memory_space<vmem>>, vector<32x64xf32>
    %cst = arith.constant dense<0.000000e+00> : vector<128x64xf32>
    %4 = tpu.matmul %1, %3, %cst {dimension_numbers = #tpu.dot_dimension_numbers<[1], [0], [0], [1], [0, 0, 1, 1], [], []>} : vector<128x32xf32>, vector<32x64xf32>, vector<128x64xf32> -> vector<128x64xf32>
    %5 = vector.extract_strided_slice %2 {offsets = [0, 0], sizes = [1, 64], strides = [1, 1]} : vector<2x64xf32> to vector<1x64xf32>
    %6 = vector.broadcast %5 : vector<1x64xf32> to vector<128x64xf32>
    %7 = arith.addf %4, %6 : vector<128x64xf32>
    %cst_6 = arith.constant 0.000000e+00 : f32
    %8 = vector.broadcast %cst_6 : f32 to vector<128x64xf32>
    %9 = arith.maximumf %7, %8 : vector<128x64xf32>
    %c0_7 = arith.constant 0 : index
    %c0_8 = arith.constant 0 : index
    %10 = vector.load %arg3[%c0_7, %c0_8] : memref<64x64xf32, #tpu.memory_space<vmem>>, vector<64x64xf32>
    %cst_9 = arith.constant dense<0.000000e+00> : vector<128x64xf32>
    %11 = tpu.matmul %9, %10, %cst_9 {dimension_numbers = #tpu.dot_dimension_numbers<[1], [0], [0], [1], [0, 0, 1, 1], [], []>} : vector<128x64xf32>, vector<64x64xf32>, vector<128x64xf32> -> vector<128x64xf32>
    %12 = vector.extract_strided_slice %2 {offsets = [1, 0], sizes = [1, 64], strides = [1, 1]} : vector<2x64xf32> to vector<1x64xf32>
    %13 = vector.broadcast %12 : vector<1x64xf32> to vector<128x64xf32>
    %14 = arith.addf %11, %13 : vector<128x64xf32>
    %cst_10 = arith.constant 0.000000e+00 : f32
    %15 = vector.broadcast %cst_10 : f32 to vector<128x64xf32>
    %16 = arith.maximumf %14, %15 : vector<128x64xf32>
    %17 = vector.shape_cast %16 : vector<128x64xf32> to vector<8x16x64xf32>
    %cst_11 = arith.constant dense<0xFF800000> : vector<8x64xf32>
    %18 = vector.multi_reduction <maximumf>, %17, %cst_11 [1] : vector<8x16x64xf32> to vector<8x64xf32>
    %c0_12 = arith.constant 0 : index
    %c0_13 = arith.constant 0 : index
    %19 = vector.load %arg5[%c0_12, %c0_13] : memref<8x64xf32, #tpu.memory_space<vmem>>, vector<8x64xf32>
    tpu.vector_store %arg5[%c0_12, %c0_13], %18 {strides = array<i32>} : memref<8x64xf32, #tpu.memory_space<vmem>>, vector<8x64xf32>,
    return
  }
  func.func @transform_0(%arg0: i32) -> (i32, i32, i32) {
    %c0_i32 = arith.constant 0 : i32
    %c0_i32_0 = arith.constant 0 : i32
    %c0_i32_1 = arith.constant 0 : i32
    return %arg0, %c0_i32, %c0_i32_0 : i32, i32, i32
  }
  func.func @transform_1(%arg0: i32) -> (i32, i32) {
    %c0_i32 = arith.constant 0 : i32
    %c0_i32_0 = arith.constant 0 : i32
    %c0_i32_1 = arith.constant 0 : i32
    return %c0_i32, %c0_i32_0 : i32, i32
  }
  func.func @transform_2(%arg0: i32) -> (i32, i32) {
    %c0_i32 = arith.constant 0 : i32
    %c0_i32_0 = arith.constant 0 : i32
    %c0_i32_1 = arith.constant 0 : i32
    return %c0_i32, %c0_i32_0 : i32, i32
  }
  func.func @transform_3(%arg0: i32) -> (i32, i32) {
    %c0_i32 = arith.constant 0 : i32
    %c0_i32_0 = arith.constant 0 : i32
    %c0_i32_1 = arith.constant 0 : i32
    return %c0_i32, %c0_i32_0 : i32, i32
  }
  func.func @transform_4(%arg0: i32) -> (i32, i32) {
    %c0_i32 = arith.constant 0 : i32
    %c0_i32_0 = arith.constant 0 : i32
    return %arg0, %c0_i32 : i32, i32
  }
}

</mosaic_0001>

<bundles_post_ra>
// kernel: tpu_custom_call.1
= control target key start
LH: loop header
LB: loop body
LE: loop exit
PB: predicated region body
PF: predicated region fallthrough
CT: control target
= control target key end

     0   :  { %9 = vsyncpa [#allocation3], 0  ;;  %s1702_s0 = inlined_call_operand.hbm [shape: f32[16,16,32], index: 0, kind: input, shape index: {}]   ;;  %s1703_s1 = inlined_call_operand.hbm [shape: f32[32,64], index: 1, kind: input, shape index: {}]   ;;  %s1704_s2 = inlined_call_operand.hbm [shape: f32[64,64], index: 2, kind: input, shape index: {}]   ;;  %s1705_s3 = inlined_call_operand.vmem [shape: f32[2,64], index: 3, kind: input, shape index: {}]   ;;  %s1706_s4 = inlined_call_operand.hbm [shape: f32[16,64], index: 4, kind: output, shape index: {}]  }
   0x1   :  { %11 = vsyncpa [#allocation3 + $0x1], 0 }
   0x2   :  { %12 = vsyncpa [#allocation6], 0 }
   0x3   :  { %13 = vsyncpa [#allocation4], 0 }
   0x4   :  { %15 = vsyncpa [#allocation4 + $0x1], 0  ;;  %s1361_s15 = smov 0   ;;  %s1363_s16 = smov 0  }
   0x5   :  { %s1365_s17 = smov 0   ;;  %s1367_s18 = smov 0  }
   0x6 LB: > { %s1382_s19 = sadd.s32 4294967295, %s1328_s18   ;;  %s903_s20 = sadd.s32 4294967294, %s1328_s18   ;;  %s1328_s18 = sphi %s1367_s18, %s1726_s18   ;;  %s1324_s17 = sphi %s1365_s17, %s1725_s17   ;;  %s1320_s16 = sphi %s1363_s16, %s1724_s16   ;;  %s1316_s15 = sphi %s1361_s15, %s1723_s15  }
   0x7   : > { %p41_p0 = scmp.ne.s32.totalorder %s1320_s16, %s1316_s15  ;;  %p1707_p1 = scmp.eq.s32.totalorder %s1382_s19, 0 }
   0x8   : > { %p134_p3 = scmp.eq.s32.totalorder %s903_s20, 1  ;;  %p904_p5 = scmp.ge.s32.totalorder %s1328_s18, 1 }
   0x9   : > { %p1391_p4 = por %p1707_p1, %p41_p0  ;;  %p141_p7 = scmp.lt.s32.totalorder %s1328_s18, 3 }
   0xa   : > { %p1396_p6 = por %p134_p3, %p41_p0  ;;  %s1330_s24 = smov [#allocation5]  }
   0xb   : > { %s1710_s21 = scalar_select %p1391_p4, 1, 0 }
   0xc   : > { %s1711_s22 = scalar_select %p1396_p6, 1, 0 }
   0xd   : > { %p1401_p8 = pnand %p904_p5, %p141_p7  ;;  %s153_s25 = sshll.u32 %s1330_s24, 4  ;;  %s1405_s25 = int_to_ptr.vmem [resolvable:$true] %s153_s25 }
   0xe   : > { %s1331_s27 = smov [#allocation7]   ;;  %s1172_s5 = scalar_lea.hbm %s1703_s1, 512 }
   0xf   : > { %p1115_p9 = pneg %p1401_p8  ;;  %s166_s28 = sshll.u32 %s1331_s27, 4  ;;  %s1416_s28 = int_to_ptr.vmem [resolvable:$true] %s166_s28 }
  0x10   : > { %p1173_p12 = scmp.ne.s32.totalorder %s1703_s1, %s1172_s5  ;;  %p1179_p5 = scmp.lt.u32.totalorder %s1172_s5, %s1703_s1 }
  0x11   : > { %p1412_p11 = pnand %p1115_p9, %p1707_p1 }
  0x13   : > { %p1174_p13 = pneg %p1412_p11 }
  0x15   : > { %p1175_p0 = pnand %p1174_p13, %p1173_p12 }
  0x17   : > { %p1176_p3 = pneg %p1175_p0 }
  0x19   : > { %p1181_p7 = pnand %p1179_p5, %p1176_p3 }
  0x1b   : > { %1184 = shalt.err (!%p1181_p7)
}
  0x1c   : > { %s1185_s10 = scalar_lea.vmem %s1405_s25, 512  ;;  %p1193_p2 = scmp.lt.s32.totalorder %s1405_s25, %s1405_s25 }
  0x1d   : > { %p1186_p9 = scmp.ne.s32.totalorder %s1405_s25, %s1185_s10  ;;  %p1194_p12 = scmp.lt.s32.totalorder %s1185_s10, %s1185_s10 }
  0x1f   : > { %p1188_p10 = pnand %p1186_p9, %p1174_p13  ;;  %p1195_p0 = por %p1194_p12, %p1193_p2 }
  0x21   : > { %p1189_p1 = pneg %p1188_p10 }
  0x23   : > { %p1196_p6 = pnand %p1195_p0, %p1189_p1 }
  0x25   : > { %1199 = shalt.err (!%p1196_p6)
}
  0x26   : > { %s1332_s11 = smov 128   ;;  %s1333_s12 = smov 8  }
  0x27   : > { %1118 = dma.hbm_to_vmem [thread:$0]  (!%p1412_p11), %s1703_s1, 512, %s1405_s25, [#allocation6], %s1332_s11, %s1332_s11, %s1333_s12  }
  0x28   : > { %s1200_s27 = scalar_lea.hbm %s1704_s2, 1024 }
  0x29   : > { %p1201_p1 = scmp.ne.s32.totalorder %s1704_s2, %s1200_s27  ;;  %p1207_p10 = scmp.lt.u32.totalorder %s1200_s27, %s1704_s2 }
  0x2b   : > { %p1203_p2 = pnand %p1201_p1, %p1174_p13 }
  0x2d   : > { %p1204_p6 = pneg %p1203_p2 }
  0x2f   : > { %p1209_p3 = pnand %p1207_p10, %p1204_p6 }
  0x31   : > { %1212 = shalt.err (!%p1209_p3)
}
  0x32   : > { %s1213_s25 = scalar_lea.vmem %s1416_s28, 1024  ;;  %p1221_p12 = scmp.lt.s32.totalorder %s1416_s28, %s1416_s28 }
  0x33   : > { %p1214_p5 = scmp.ne.s32.totalorder %s1416_s28, %s1213_s25  ;;  %p1222_p0 = scmp.lt.s32.totalorder %s1213_s25, %s1213_s25 }
  0x35   : > { %p1216_p7 = pnand %p1214_p5, %p1174_p13  ;;  %p1223_p1 = por %p1222_p0, %p1221_p12 }
  0x37   : > { %p1217_p9 = pneg %p1216_p7 }
  0x39   : > { %p1224_p2 = pnand %p1223_p1, %p1217_p9 }
  0x3b   : > { %1227 = shalt.err (!%p1224_p2)
}
  0x3c   : > { %1121 = dma.hbm_to_vmem [thread:$0]  (!%p1412_p11), %s1704_s2, 1024, %s1416_s28, [#allocation6], %s1332_s11, %s1332_s11, %s1333_s12  }
  0x3d   : > { %s1477_s26 = sadd.s32 1, %s1328_s18   ;;  %s28_s9 = sadd.s32 1, %s1324_s17 }
  0x3e   : > { %s25_s10 = ssub.s32 %s1328_s18, %s1477_s26  ;;  %p35_p13 = scmp.ne.s32.totalorder %s1324_s17, %s1320_s16 }
  0x3f   : > { %p26_p6 = scmp.eq.s32.totalorder %s25_s10, 0  ;;  %p36_p10 = scmp.eq.s32.totalorder %s1328_s18, 0 }
  0x40   : > { %p1714_p3 = scmp.eq.s32.totalorder %s1382_s19, 1  ;;  %p1132_p7 = scmp.lt.s32.totalorder %s1328_s18, 2 }
  0x41   : > { %s1493_s14 = scalar_select %p26_p6, %s1324_s17, %s28_s9  }
  0x42   : > { %p1487_p5 = por %p1714_p3, %p35_p13  ;;  %p37_p9 = por %p36_p10, %p35_p13 }
  0x43   : > { %s183_s20 = sand.u32 1, %s1324_s17   ;;  %s954_s28 = sshll.u32 %s1328_s18, 11 }
  0x44   : > { %s1715_s13 = scalar_select %p1487_p5, 1, 0 }
  0x45   : > { %s908_s24 = sshll.u32 %s183_s20, 7  ;;  %s1500_s30 = scalar_lea.hbm %s1702_s0, %s954_s28 }
  0x46   : > { %s187_s5 = scalar_lea.vmem [#allocation2], %s908_s24  ;;  %p1504_p11 = pnand %p1132_p7, %p37_p9 }
  0x47   : > { %s195_s6 = sshll.u32 %s187_s5, 4  ;;  %s1508_s7 = scalar_lea.sflag [#allocation3], %s183_s20  ;;  %s1502_s6 = int_to_ptr.vmem [resolvable:$true] %s195_s6 }
  0x48   : > { %s1228_s8 = scalar_lea.hbm %s1500_s30, 2048  ;;  %p1230_p0 = pneg %p1504_p11 }
  0x49   : > { %p1229_p12 = scmp.ne.s32.totalorder %s1500_s30, %s1228_s8  ;;  %s1233_s24 = scalar_lea.hbm %s1702_s0, 4096 }
  0x4a   : > { %p1234_p13 = scmp.lt.u32.totalorder %s1500_s30, %s1702_s0  ;;  %p1235_p6 = scmp.lt.u32.totalorder %s1233_s24, %s1228_s8 }
  0x4b   : > { %p1231_p1 = pnand %p1230_p0, %p1229_p12  ;;  %p1237_p3 = scmp.lt.u32.totalorder %s1228_s8, %s1500_s30 }
  0x4c   : > { %p1236_p10 = por %p1235_p6, %p1234_p13 }
  0x4d   : > { %p1232_p2 = pneg %p1231_p1 }
  0x4e   : > { %p1238_p7 = por %p1237_p3, %p1236_p10 }
  0x50   : > { %p1239_p9 = pnand %p1238_p7, %p1232_p2 }
  0x52   : > { %1242 = shalt.err (!%p1239_p9)
}
  0x53   : > { %s1243_s20 = scalar_lea.vmem %s1502_s6, 2048  ;;  %s1334_s29 = smov [#allocation2]  }
  0x54   : > { %p1244_p12 = scmp.ne.s32.totalorder %s1502_s6, %s1243_s20  ;;  %s1248_s5 = sshll.u32 %s1334_s29, 4  ;;  %s1249_s5 = int_to_ptr.vmem [resolvable:$false] %s1248_s5 }
  0x55   : > { %s1250_s9 = scalar_lea.vmem %s1249_s5, 4096  ;;  %p1251_p4 = scmp.lt.s32.totalorder %s1502_s6, %s1249_s5 }
  0x56   : > { %p1246_p1 = pnand %p1244_p12, %p1230_p0  ;;  %p1252_p13 = scmp.lt.s32.totalorder %s1250_s9, %s1243_s20 }
  0x58   : > { %p1247_p5 = pneg %p1246_p1  ;;  %p1253_p6 = por %p1252_p13, %p1251_p4 }
  0x5a   : > { %p1254_p10 = pnand %p1253_p6, %p1247_p5 }
  0x5c   : > { %1257 = shalt.err (!%p1254_p10)
}
  0x5d   : > { %1125 = dma.hbm_to_vmem [thread:$0]  (!%p1504_p11), %s1500_s30, 2048, %s1502_s6, %s1508_s7, %s1332_s11, %s1332_s11, %s1333_s12  }
  0x5e   : > { %207 = sbr.rel (%p1401_p8) target bundleno = 609 (0x261), region = 36  ;;  %s1542_s8 = sand.u32 (!%p1401_p8), 1, %s1320_s16  }
  0x5f   : > { %s913_s10 = sshll.u32 (!%p1401_p8), %s1542_s8, 7  ;;  %s210_s24 = scalar_lea.sflag (!%p1401_p8), [#allocation3], %s1542_s8 }
  0x60   : > { %s1546_s28 = scalar_lea.vmem (!%p1401_p8), [#allocation2], %s913_s10  ;;  %p1717_p4 = scmp.ne.s32.totalorder (!%p1401_p8), %s1710_s21, 0 }
  0x65   : > { %1303 = dma.done.wait (%p1717_p4), %s210_s24, 2048  }
  0x66   : > { %1305 = vsyncadd (%p1717_p4), %s210_s24, 4294965248  ;;  %p1718_p5 = scmp.eq.s32.totalorder %s1382_s19, 0 }
  0x68   : > { %1307 = dma.done.wait (%p1718_p5), [#allocation6], 1536   ;;  %p1719_p8 = pmov %p1718_p5 }
  0x69   : > { %vm272_vm0 = vcmask 261120   ;;  %v264_v0 = vld [vmem:[#allocation5] sm:$0xff]  ;;  %v265_v1 = vld [vmem:[#allocation5 + $0x8] sm:$0xff]  ;;  %v266_v2 = vld [vmem:[#allocation5 + $0x10] sm:$0xff]  ;;  %v268_v34 = vlaneseq  ;;  %vm494_vm1 = vcmask 523264   ;;  %vm784_vm2 = vcmask 1041409  }
  0x6a   : > { %1309 = vsyncadd (%p1719_p8), [#allocation6], 4294965760  ;;  %v1071_v3 = vpack.c.bf16 %v265_v1, %v264_v0  ;;  %v267_v4 = vld [vmem:[#allocation5 + $0x18] sm:$0xff]  ;;  %v247_v5 = vld [vmem:[%s1546_s28] sm:$0xff]  ;;  %vm786_vm3 = vcmask 1042434   ;;  %vm788_vm4 = vcmask 1043459  }
  0x6b   : > { %v1075_v6 = vpack.c.bf16 %v267_v4, %v266_v2  ;;  %1007 = vmatprep.mubr.msk.f32.mxu0 %vm272_vm0, %v247_v5  ;;  %v482_v7 = vld [vmem:[#allocation7] sm:$0xff]  ;;  %v483_v8 = vld [vmem:[#allocation7 + $0x8] sm:$0xff]  ;;  %v484_v9 = vld [vmem:[#allocation7 + $0x10] sm:$0xff]  ;;  %v1588_v35 = vshrl.u32 %v268_v34, 7  ;;  %vm790_vm5 = vcmask 1044484   ;;  %vm792_vm6 = vcmask 1045509  }
  0x6c   : > { %1072 = vmatprep.subr.bf16.mxu0 %v1071_v3  ;;  %v485_v10 = vld [vmem:[#allocation7 + $0x18] sm:$0xff]  ;;  %v248_v11 = vld [vmem:[%s1546_s28 + $0x8] sm:$0xff]  ;;  %v1079_v12 = vpack.c.bf16 %v483_v8, %v482_v7  ;;  %v249_v13 = vld [vmem:[%s1546_s28 + $0x10] sm:$0xff]  ;;  %s916_s11 = sshll.u32 %s1542_s8, 3  ;;  %vm794_vm7 = vcmask 1046534   ;;  %s950_s12 = sshll.u32 %s1382_s19, 7 }
  0x6d   : > { %1074 = vmatpush3.bf16.msra.mxu0 %v1071_v3  ;;  %v1083_v14 = vpack.c.bf16 %v485_v10, %v484_v9  ;;  %v486_v15 = vld [vmem:[#allocation7 + $0x20] sm:$0xff]  ;;  %v487_v16 = vld [vmem:[#allocation7 + $0x28] sm:$0xff]  ;;  %v250_v17 = vld [vmem:[%s1546_s28 + $0x18] sm:$0xff]  ;;  %v270_v36 = vsub.s32 0, %v1588_v35  ;;  %s245_s30 = scalar_lea.vmem [#allocation8], %s916_s11  ;;  %vm796_vm8 = vcmask 1047559   ;;  %s1657_s27 = scalar_lea.hbm %s1706_s4, %s950_s12 }
  0x6e   : > { %1076 = vmatprep.subr.bf16.mxu0 %v1075_v6  ;;  %1095 = vmatprep.subr.bf16.mxu1 %v1079_v12  ;;  %v251_v18 = vld [vmem:[%s1546_s28 + $0x20] sm:$0xff]  ;;  %v1087_v19 = vpack.c.bf16 %v487_v16, %v486_v15  ;;  %v252_v20 = vld [vmem:[%s1546_s28 + $0x28] sm:$0xff]  ;;  %v253_v21 = vld [vmem:[%s1546_s28 + $0x30] sm:$0xff]  ;;  %s814_s6 = sshll.u32 %s245_s30, 4  ;;  %s801_s20 = scalar_lea.sflag [#allocation4], %s1542_s8  ;;  %s1659_s6 = int_to_ptr.vmem [resolvable:$true] %s814_s6 }
  0x6f   : > { %1099 = vmatpush3.bf16.msra.mxu1 %v1079_v12  ;;  %v254_v22 = vld [vmem:[%s1546_s28 + $0x38] sm:$0xff]  ;;  %v255_v23 = vld [vmem:[%s1546_s28 + $0x40] sm:$0xff]  ;;  %v256_v24 = vld [vmem:[%s1546_s28 + $0x48] sm:$0xff]  ;;  %s1258_s29 = scalar_lea.vmem %s1659_s6, 128  ;;  %p1720_p0 = scmp.ne.s32.totalorder %s1715_s13, 0 }
  0x70   : > { %1096 = vmatprep.subr.bf16.mxu1 %v1083_v14  ;;  %v257_v25 = vld [vmem:[%s1546_s28 + $0x50] sm:$0xff]  ;;  %v258_v26 = vld [vmem:[%s1546_s28 + $0x58] sm:$0xff]  ;;  %v259_v27 = vld [vmem:[%s1546_s28 + $0x60] sm:$0xff]  ;;  %p1259_p11 = scmp.ne.s32.totalorder %s1659_s6, %s1258_s29  ;;  %s1335_s19 = smov [#allocation8]  }
  0x71   : > { %1078 = vmatpush3.bf16.msra.mxu0 %v1075_v6  ;;  %v260_v28 = vld [vmem:[%s1546_s28 + $0x68] sm:$0xff]  ;;  %v261_v29 = vld [vmem:[%s1546_s28 + $0x70] sm:$0xff]  ;;  %v262_v30 = vld [vmem:[%s1546_s28 + $0x78] sm:$0xff]  ;;  %s1262_s5 = sshll.u32 %s1335_s19, 4  ;;  %s1263_s5 = int_to_ptr.vmem [resolvable:$false] %s1262_s5 }
  0x72   : > { %1080 = vmatprep.subr.bf16.mxu0 %v1079_v12  ;;  %v488_v31 = vld [vmem:[#allocation7 + $0x30] sm:$0xff]  ;;  %v489_v32 = vld [vmem:[#allocation7 + $0x38] sm:$0xff]  ;;  %v1594_v37 = vld [vmem:[%s1705_s3] sm:$0x3]  ;;  %p1260_p2 = pnand %p1259_p11, %p1720_p0  ;;  %s1264_s9 = scalar_lea.vmem %s1263_s5, 256 }
  0x73   : > { %1100 = vmatpush3.bf16.msra.mxu1 %v1083_v14  ;;  %v1091_v33 = vpack.c.bf16 %v489_v32, %v488_v31  ;;  %v271_v38 = vrot.slane %v1594_v37, %v270_v36  ;;  %p1265_p7 = scmp.lt.s32.totalorder %s1659_s6, %s1263_s5  ;;  %p1266_p9 = scmp.lt.s32.totalorder %s1264_s9, %s1258_s29 }
  0x74   : > { %1008 = vmatmul.mubr.msk.f32.vlgmr.msra.gmra.mrb[0].mxu0 %vm272_vm0, %v248_v11  ;;  %1097 = vmatprep.subr.bf16.mxu1 %v1087_v19  ;;  %p1261_p3 = pneg %p1260_p2 }
  0x75   : > { %1010 = vmatprep.mubr.msk.f32.mxu0 %vm272_vm0, %v249_v13  ;;  %1082 = vmatpush3.bf16.msra.mxu0 %v1079_v12  ;;  %p1267_p12 = por %p1266_p9, %p1265_p7 }
  0x76   : > { %1084 = vmatprep.subr.bf16.mxu0 %v1083_v14 }
  0x77   : > { %1101 = vmatpush3.bf16.msra.mxu1 %v1087_v19  ;;  %p1268_p1 = pnand %p1267_p12, %p1261_p3 }
  0x78   : > { %1011 = vmatmul.mubr.msk.f32.gmra.mrb[2].mxu0 %vm272_vm0, %v250_v17  ;;  %1098 = vmatprep.subr.bf16.mxu1 %v1091_v33 }
  0x79   : > { %1013 = vmatprep.mubr.msk.f32.mxu0 %vm272_vm0, %v251_v18  ;;  %1086 = vmatpush3.bf16.msra.mxu0 %v1083_v14 }
  0x7a   : > { %1088 = vmatprep.subr.bf16.mxu0 %v1087_v19 }
  0x7b   : > { %1102 = vmatpush3.bf16.msra.mxu1 %v1091_v33 }
  0x7c   : > { %1014 = vmatmul.mubr.msk.f32.gmra.mrb[4].mxu0 %vm272_vm0, %v252_v20 }
  0x7d   : > { %1016 = vmatprep.mubr.msk.f32.mxu0 %vm272_vm0, %v253_v21  ;;  %1090 = vmatpush3.bf16.msra.mxu0 %v1087_v19 }
  0x7e   : > { %1092 = vmatprep.subr.bf16.mxu0 %v1091_v33 }
  0x80   : > { %1017 = vmatmul.mubr.msk.f32.gmra.mrb[6].mxu0 %vm272_vm0, %v254_v22 }
  0x81   : > { %1019 = vmatprep.mubr.msk.f32.mxu0 %vm272_vm0, %v255_v23  ;;  %1094 = vmatpush3.bf16.msra.mxu0 %v1091_v33  ;;  %v492_v23 = vsub.s32 1, %v1588_v35 }
  0x84   : > { %1020 = vmatmul.mubr.msk.f32.gmra.mrb[8].mxu0 %vm272_vm0, %v256_v24  ;;  %v1615_v24 = vrot.slane %v1594_v37, %v492_v23 }
  0x85   : > { %1022 = vmatprep.mubr.msk.f32.mxu0 %vm272_vm0, %v257_v25 }
  0x88   : > { %1023 = vmatmul.mubr.msk.f32.gmra.mrb[10].mxu0 %vm272_vm0, %v258_v26 }
  0x89   : > { %1025 = vmatprep.mubr.msk.f32.mxu0 %vm272_vm0, %v259_v27 }
  0x8c   : > { %1026 = vmatmul.mubr.msk.f32.gmra.mrb[12].mxu0 %vm272_vm0, %v260_v28 }
  0x8d   : > { %1028 = vmatprep.mubr.msk.f32.mxu0 %vm272_vm0, %v261_v29 }
  0x90   : > { %1029 = vmatmul.mubr.msk.f32.gmra.mrb[14].mxu0 %vm272_vm0, %v262_v30 }
 0x147   : > { %v1009_v39 = vpop.f32.mrb[0].mxu0 }
 0x148   : > { %v393_v40 = vadd.f32 %v1009_v39, %v271_v38  ;;  %v387_v41 = vpop.f32.mrb[1].mxu0 }
 0x149   : > { %v388_v42 = vadd.f32 %v387_v41, %v271_v38 }
 0x14a   : > { %v467_v45 = vmax.f32 %v393_v40, 0.0 }
 0x14b   : > { %v466_v43 = vmax.f32 %v388_v42, 0.0  ;;  %v1012_v44 = vpop.f32.mrb[2].mxu0 }
 0x14c   : > { %v403_v46 = vadd.f32 %v1012_v44, %v271_v38  ;;  %v397_v47 = vpop.f32.mrb[3].mxu0 }
 0x14d   : > { %v398_v48 = vadd.f32 %v397_v47, %v271_v38  ;;  %1047 = vmatprep.mubr.msk.f32.mxu0 %vm494_vm1, %v466_v43 }
 0x14e   : > { %1048 = vmatmul.mubr.msk.f32.vlgmr.msra.gmra.mrb[16].mxu0 %vm494_vm1, %v467_v45  ;;  %v469_v51 = vmax.f32 %v403_v46, 0.0 }
 0x14f   : > { %v468_v49 = vmax.f32 %v398_v48, 0.0  ;;  %v1015_v50 = vpop.f32.mrb[4].mxu0 }
 0x150   : > { %v413_v52 = vadd.f32 %v1015_v50, %v271_v38  ;;  %v407_v53 = vpop.f32.mrb[5].mxu0 }
 0x151   : > { %v408_v54 = vadd.f32 %v407_v53, %v271_v38  ;;  %1050 = vmatprep.mubr.msk.f32.mxu1 %vm494_vm1, %v468_v49 }
 0x152   : > { %1051 = vmatmul.mubr.msk.f32.vlgmr.msra.gmra.mrb[0].mxu1 %vm494_vm1, %v469_v51  ;;  %v471_v57 = vmax.f32 %v413_v52, 0.0 }
 0x153   : > { %v470_v55 = vmax.f32 %v408_v54, 0.0  ;;  %v1018_v56 = vpop.f32.mrb[6].mxu0 }
 0x154   : > { %v423_v58 = vadd.f32 %v1018_v56, %v271_v38  ;;  %v417_v59 = vpop.f32.mrb[7].mxu0 }
 0x155   : > { %v418_v60 = vadd.f32 %v417_v59, %v271_v38  ;;  %1053 = vmatprep.mubr.msk.f32.mxu1 %vm494_vm1, %v470_v55 }
 0x156   : > { %1054 = vmatmul.mubr.msk.f32.gmra.mrb[2].mxu1 %vm494_vm1, %v471_v57  ;;  %v473_v63 = vmax.f32 %v423_v58, 0.0 }
 0x157   : > { %v472_v61 = vmax.f32 %v418_v60, 0.0  ;;  %v1021_v62 = vpop.f32.mrb[8].mxu0 }
 0x158   : > { %v433_v0 = vadd.f32 %v1021_v62, %v271_v38  ;;  %v427_v1 = vpop.f32.mrb[9].mxu0 }
 0x159   : > { %v428_v2 = vadd.f32 %v427_v1, %v271_v38  ;;  %1056 = vmatprep.mubr.msk.f32.mxu1 %vm494_vm1, %v472_v61 }
 0x15a   : > { %1057 = vmatmul.mubr.msk.f32.gmra.mrb[4].mxu1 %vm494_vm1, %v473_v63  ;;  %v475_v5 = vmax.f32 %v433_v0, 0.0 }
 0x15b   : > { %v474_v3 = vmax.f32 %v428_v2, 0.0  ;;  %v1024_v4 = vpop.f32.mrb[10].mxu0 }
 0x15c   : > { %v443_v6 = vadd.f32 %v1024_v4, %v271_v38  ;;  %v437_v7 = vpop.f32.mrb[11].mxu0 }
 0x15d   : > { %v438_v8 = vadd.f32 %v437_v7, %v271_v38  ;;  %1059 = vmatprep.mubr.msk.f32.mxu1 %vm494_vm1, %v474_v3 }
 0x15e   : > { %1060 = vmatmul.mubr.msk.f32.gmra.mrb[6].mxu1 %vm494_vm1, %v475_v5  ;;  %v477_v11 = vmax.f32 %v443_v6, 0.0 }
 0x15f   : > { %v476_v9 = vmax.f32 %v438_v8, 0.0  ;;  %v1027_v10 = vpop.f32.mrb[12].mxu0 }
 0x160   : > { %v453_v12 = vadd.f32 %v1027_v10, %v271_v38  ;;  %v447_v13 = vpop.f32.mrb[13].mxu0 }
 0x161   : > { %v448_v14 = vadd.f32 %v447_v13, %v271_v38  ;;  %1062 = vmatprep.mubr.msk.f32.mxu1 %vm494_vm1, %v476_v9 }
 0x162   : > { %1063 = vmatmul.mubr.msk.f32.gmra.mrb[8].mxu1 %vm494_vm1, %v477_v11  ;;  %v479_v17 = vmax.f32 %v453_v12, 0.0 }
 0x163   : > { %v478_v15 = vmax.f32 %v448_v14, 0.0  ;;  %v1030_v16 = vpop.f32.mrb[14].mxu0 }
 0x164   : > { %v463_v18 = vadd.f32 %v1030_v16, %v271_v38  ;;  %v457_v19 = vpop.f32.mrb[15].mxu0 }
 0x165   : > { %v458_v20 = vadd.f32 %v457_v19, %v271_v38  ;;  %1065 = vmatprep.mubr.msk.f32.mxu1 %vm494_vm1, %v478_v15 }
 0x166   : > { %1066 = vmatmul.mubr.msk.f32.gmra.mrb[10].mxu1 %vm494_vm1, %v479_v17  ;;  %v481_v22 = vmax.f32 %v463_v18, 0.0 }
 0x167   : > { %v480_v21 = vmax.f32 %v458_v20, 0.0 }
 0x169   : > { %1068 = vmatprep.mubr.msk.f32.mxu1 %vm494_vm1, %v480_v21 }
 0x16a   : > { %1069 = vmatmul.mubr.msk.f32.gmra.mrb[12].mxu1 %vm494_vm1, %v481_v22 }
 0x221   : > { %v1049_v25 = vpop.f32.mrb[16].mxu0 }
 0x222   : > { %v615_v26 = vadd.f32 %v1049_v25, %v1615_v24  ;;  %v609_v27 = vpop.f32.mrb[17].mxu0 }
 0x223   : > { %v610_v28 = vadd.f32 %v609_v27, %v1615_v24 }
 0x224   : > { %v689_v29 = vmax.f32 %v615_v26, 0.0 }
 0x225   : > { %v688_v30 = vmax.f32 %v610_v28, 0.0  ;;  %v1052_v31 = vpop.f32.mrb[0].mxu1 }
 0x226   : > { %v705_v32 = vsel %vm494_vm1, %v689_v29, -inf  ;;  %v625_v33 = vadd.f32 %v1052_v31, %v1615_v24  ;;  %v619_v34 = vpop.f32.mrb[1].mxu1 }
 0x227   : > { %v704_v36 = vsel %vm494_vm1, %v688_v30, -inf  ;;  %v620_v35 = vadd.f32 %v619_v34, %v1615_v24 }
 0x228   : > { %v706_v37 = vmax.f32 %v704_v36, %v705_v32  ;;  %v691_v38 = vmax.f32 %v625_v33, 0.0 }
 0x229   : > { %v690_v39 = vmax.f32 %v620_v35, 0.0  ;;  %v1055_v40 = vpop.f32.mrb[2].mxu1 }
 0x22a   : > { %v707_v41 = vrot.slane %v706_v37, 4  ;;  %v714_v42 = vsel %vm494_vm1, %v691_v38, -inf  ;;  %v635_v43 = vadd.f32 %v1055_v40, %v1615_v24  ;;  %v629_v44 = vpop.f32.mrb[3].mxu1 }
 0x22b   : > { %v713_v45 = vsel %vm494_vm1, %v690_v39, -inf  ;;  %v630_v46 = vadd.f32 %v629_v44, %v1615_v24 }
 0x22c   : > { %v708_v47 = vmax.f32 %v706_v37, %v707_v41  ;;  %v715_v48 = vmax.f32 %v713_v45, %v714_v42  ;;  %v693_v49 = vmax.f32 %v635_v43, 0.0 }
 0x22d   : > { %v692_v50 = vmax.f32 %v630_v46, 0.0  ;;  %v1058_v51 = vpop.f32.mrb[4].mxu1 }
 0x22e   : > { %v709_v52 = vrot.slane %v708_v47, 2  ;;  %v716_v53 = vrot.slane %v715_v48, 4  ;;  %v723_v54 = vsel %vm494_vm1, %v693_v49, -inf  ;;  %v645_v55 = vadd.f32 %v1058_v51, %v1615_v24  ;;  %v639_v56 = vpop.f32.mrb[5].mxu1 }
 0x22f   : > { %v722_v57 = vsel %vm494_vm1, %v692_v50, -inf  ;;  %v640_v58 = vadd.f32 %v639_v56, %v1615_v24 }
 0x230   : > { %v710_v59 = vmax.f32 %v708_v47, %v709_v52  ;;  %v717_v60 = vmax.f32 %v715_v48, %v716_v53  ;;  %v724_v61 = vmax.f32 %v722_v57, %v723_v54  ;;  %v695_v62 = vmax.f32 %v645_v55, 0.0 }
 0x231   : > { %v694_v63 = vmax.f32 %v640_v58, 0.0  ;;  %v1061_v0 = vpop.f32.mrb[6].mxu1 }
 0x232   : > { %v718_v1 = vrot.slane %v717_v60, 2  ;;  %v725_v2 = vrot.slane %v724_v61, 4  ;;  %v732_v3 = vsel %vm494_vm1, %v695_v62, -inf  ;;  %v649_v4 = vpop.f32.mrb[7].mxu1  ;;  %v711_v5 = vrot.slane %v710_v59, 1 }
 0x233   : > { %v731_v6 = vsel %vm494_vm1, %v694_v63, -inf  ;;  %v655_v7 = vadd.f32 %v1061_v0, %v1615_v24  ;;  %v650_v8 = vadd.f32 %v649_v4, %v1615_v24 }
 0x234   : > { %v719_v9 = vmax.f32 %v717_v60, %v718_v1  ;;  %v726_v10 = vmax.f32 %v724_v61, %v725_v2  ;;  %v733_v11 = vmax.f32 %v731_v6, %v732_v3  ;;  %v712_v20 = vmax.f32 %v710_v59, %v711_v5 }
 0x235   : > { %v697_v12 = vmax.f32 %v655_v7, 0.0  ;;  %v696_v13 = vmax.f32 %v650_v8, 0.0  ;;  %v1064_v14 = vpop.f32.mrb[8].mxu1 }
 0x236   : > { %v720_v15 = vrot.slane %v719_v9, 1  ;;  %v727_v16 = vrot.slane %v726_v10, 2  ;;  %v734_v17 = vrot.slane %v733_v11, 4  ;;  %v665_v18 = vadd.f32 %v1064_v14, %v1615_v24  ;;  %v659_v19 = vpop.f32.mrb[9].mxu1 }
 0x237   : > { %v741_v21 = vsel %vm494_vm1, %v697_v12, -inf  ;;  %v740_v22 = vsel %vm494_vm1, %v696_v13, -inf  ;;  %v660_v23 = vadd.f32 %v659_v19, %v1615_v24 }
 0x238   : > { %v721_v25 = vmax.f32 %v719_v9, %v720_v15  ;;  %v728_v26 = vmax.f32 %v726_v10, %v727_v16  ;;  %v735_v27 = vmax.f32 %v733_v11, %v734_v17  ;;  %v742_v28 = vmax.f32 %v740_v22, %v741_v21 }
 0x239   : > { %v699_v29 = vmax.f32 %v665_v18, 0.0  ;;  %v698_v30 = vmax.f32 %v660_v23, 0.0  ;;  %v1067_v31 = vpop.f32.mrb[10].mxu1 }
 0x23a   : > { %v785_v32 = vsel %vm784_vm2, %v721_v25, %v712_v20  ;;  %v729_v33 = vrot.slane %v728_v26, 1  ;;  %v736_v34 = vrot.slane %v735_v27, 2  ;;  %v743_v36 = vrot.slane %v742_v28, 4  ;;  %v669_v35 = vpop.f32.mrb[11].mxu1 }
 0x23b   : > { %v750_v37 = vsel %vm494_vm1, %v699_v29, -inf  ;;  %v749_v38 = vsel %vm494_vm1, %v698_v30, -inf  ;;  %v675_v39 = vadd.f32 %v1067_v31, %v1615_v24  ;;  %v670_v40 = vadd.f32 %v669_v35, %v1615_v24 }
 0x23c   : > { %v730_v41 = vmax.f32 %v728_v26, %v729_v33  ;;  %v737_v42 = vmax.f32 %v735_v27, %v736_v34  ;;  %v744_v43 = vmax.f32 %v742_v28, %v743_v36  ;;  %v751_v44 = vmax.f32 %v749_v38, %v750_v37 }
 0x23d   : > { %v701_v45 = vmax.f32 %v675_v39, 0.0  ;;  %v700_v46 = vmax.f32 %v670_v40, 0.0  ;;  %v1070_v47 = vpop.f32.mrb[12].mxu1 }
 0x23e   : > { %v787_v48 = vsel %vm786_vm3, %v730_v41, %v785_v32  ;;  %v738_v49 = vrot.slane %v737_v42, 1  ;;  %v745_v50 = vrot.slane %v744_v43, 2  ;;  %v752_v51 = vrot.slane %v751_v44, 4  ;;  %v679_v52 = vpop.f32.mrb[13].mxu1 }
 0x23f   : > { %v759_v53 = vsel %vm494_vm1, %v701_v45, -inf  ;;  %v758_v54 = vsel %vm494_vm1, %v700_v46, -inf  ;;  %v685_v55 = vadd.f32 %v1070_v47, %v1615_v24  ;;  %v680_v56 = vadd.f32 %v679_v52, %v1615_v24 }
 0x240   : > { %v739_v57 = vmax.f32 %v737_v42, %v738_v49  ;;  %v746_v58 = vmax.f32 %v744_v43, %v745_v50  ;;  %v753_v59 = vmax.f32 %v751_v44, %v752_v51  ;;  %v760_v60 = vmax.f32 %v758_v54, %v759_v53 }
 0x241   : > { %v703_v61 = vmax.f32 %v685_v55, 0.0  ;;  %v702_v62 = vmax.f32 %v680_v56, 0.0 }
 0x242   : > { %v789_v63 = vsel %vm788_vm4, %v739_v57, %v787_v48  ;;  %v747_v0 = vrot.slane %v746_v58, 1  ;;  %v754_v1 = vrot.slane %v753_v59, 2  ;;  %v761_v2 = vrot.slane %v760_v60, 4 }
 0x243   : > { %v768_v3 = vsel %vm494_vm1, %v703_v61, -inf  ;;  %v767_v4 = vsel %vm494_vm1, %v702_v62, -inf }
 0x244   : > { %v748_v5 = vmax.f32 %v746_v58, %v747_v0  ;;  %v755_v6 = vmax.f32 %v753_v59, %v754_v1  ;;  %v762_v24 = vmax.f32 %v760_v60, %v761_v2  ;;  %v769_v7 = vmax.f32 %v767_v4, %v768_v3 }
 0x246   : > { %v791_v8 = vsel %vm790_vm5, %v748_v5, %v789_v63  ;;  %v756_v9 = vrot.slane %v755_v6, 1  ;;  %v763_v10 = vrot.slane %v762_v24, 2  ;;  %v770_v11 = vrot.slane %v769_v7, 4 }
 0x248   : > { %v757_v12 = vmax.f32 %v755_v6, %v756_v9  ;;  %v764_v13 = vmax.f32 %v762_v24, %v763_v10  ;;  %v771_v14 = vmax.f32 %v769_v7, %v770_v11 }
 0x24a   : > { %v765_v15 = vrot.slane %v764_v13, 1  ;;  %v772_v16 = vrot.slane %v771_v14, 2  ;;  %v793_v17 = vsel %vm792_vm6, %v757_v12, %v791_v8 }
 0x24c   : > { %v766_v18 = vmax.f32 %v764_v13, %v765_v15  ;;  %v773_v19 = vmax.f32 %v771_v14, %v772_v16 }
 0x24e   : > { %v774_v20 = vrot.slane %v773_v19, 1  ;;  %v795_v21 = vsel %vm794_vm7, %v766_v18, %v793_v17 }
 0x250   : > { %v775_v22 = vmax.f32 %v773_v19, %v774_v20 }
 0x252   : > { %v797_v23 = vsel %vm796_vm8, %v775_v22, %v795_v21 }
 0x253   : > { %799 = vst.msk [vmem:[%s245_s30] sm:$0xff] %vm494_vm1, %v797_v23 }
 0x254   : > { %1271 = shalt.err (!%p1268_p1)
}
 0x255   : > { %s1272_s8 = scalar_lea.hbm %s1657_s27, 128  ;;  %s1276_s28 = scalar_lea.hbm %s1706_s4, 256 }
 0x256   : > { %p1273_p13 = scmp.ne.s32.totalorder %s1657_s27, %s1272_s8  ;;  %p1277_p4 = scmp.lt.u32.totalorder %s1657_s27, %s1706_s4 }
 0x257   : > { %p1278_p5 = scmp.lt.u32.totalorder %s1276_s28, %s1272_s8  ;;  %p1280_p11 = scmp.lt.u32.totalorder %s1272_s8, %s1657_s27 }
 0x258   : > { %p1274_p6 = pnand %p1273_p13, %p1720_p0 }
 0x259   : > { %p1279_p8 = por %p1278_p5, %p1277_p4 }
 0x25a   : > { %p1275_p10 = pneg %p1274_p6 }
 0x25b   : > { %p1281_p2 = por %p1280_p11, %p1279_p8 }
 0x25d   : > { %p1282_p3 = pnand %p1281_p2, %p1275_p10 }
 0x25f   : > { %1285 = shalt.err (!%p1282_p3)
}
 0x260   : > { %1113 = dma.vmem_to_hbm [thread:$0]  (%p1720_p0), %s1659_s6, 128, %s1657_s27, %s801_s20  }
 0x261 PF: > { %s826_s11 = sand.u32 1, %s1316_s15   ;;  %p1721_p7 = scmp.ne.s32.totalorder %s1711_s22, 0 }
 0x262   : > { %p1722_p9 = scmp.ge.s32.totalorder %s1328_s18, 2  ;;  %s827_s12 = scalar_lea.sflag [#allocation4], %s826_s11 }
 0x264   : > { %p1127_p12 = pnand %p1722_p9, %p1721_p7 }
 0x266   : > { %1311 = dma.done.wait (!%p1127_p12), %s827_s12, 128  }
 0x267   : > { %1313 = vsyncadd (!%p1127_p12), %s827_s12, 4294967168  ;;  %p18_p1 = scmp.ge.s32.totalorder %s1477_s26, 4   ;;  %s1723_s15 = smov %s1320_s16 }
 0x268   : > { %s1724_s16 = smov %s1324_s17  ;;  %s1725_s17 = smov %s1493_s14 }
 0x269   : > { %s1726_s18 = smov %s1477_s26  ;;  %20 = sbr.rel (!%p18_p1) target bundleno = 6 (0x6), region = 89 }
 0x270   :  { %832 = vsyncpa [#allocation3], 1 }
 0x271   :  { %834 = vsyncpa [#allocation3 + $0x1], 1 }
 0x272   :  { %835 = vsyncpa [#allocation6], 1 }
 0x273   :  { %836 = vsyncpa [#allocation4], 1 }
 0x274   :  { %838 = vsyncpa [#allocation4 + $0x1], 1 }

</bundles_post_ra>
